<compile_context>
chip_gen: v7x
topology: tpu7x:2x2x1
jax: 0.10.0
libtpu: 0.0.40
codegen_flags: <defaults>
</compile_context>

<pallas_src>
import functools
import math

import jax
import jax.numpy as jnp
from jax.experimental import pallas as pl
from jax.experimental.pallas import tpu as pltpu


_TM, _TN, _TK = 512, 512, 512        # tile-size targets (trimmed to divide dims / fit VMEM)


@functools.lru_cache(maxsize=None)
def _vmem_budget_bytes():
    """~75% of physical VMEM: ~96 MiB on v5e/v6e, ~48 MiB on v7x; safe fallback 48 MiB."""
    try:
        cap = getattr(pltpu.get_tpu_info(), "vmem_capacity_bytes", None)
        if cap:
            return int(cap) * 3 // 4
    except Exception:
        pass
    return 48 * 1024 * 1024


def _compiler_params(semantics):
    return pltpu.CompilerParams(dimension_semantics=semantics,
                                vmem_limit_bytes=_vmem_budget_bytes())


def _pick_tile(dim, target, align):
    """Largest tile <= target that divides `dim` and is `align`-aligned, else the full dim."""
    if dim <= target:
        return dim
    t = (target // align) * align
    while t >= align:
        if dim % t == 0:
            return t
        t -= align
    return dim


def _row_tile(n_rows, bytes_per_row, target=_TM, frac=0.4):
    """16-aligned row tile whose row-proportional VMEM footprint stays within frac*budget."""
    cap = max(16, int(_vmem_budget_bytes() * frac) // max(int(bytes_per_row), 1))
    return _pick_tile(n_rows, min(target, cap), 16)


# ----------------------------------------------------------------------------
# Tiled linear: y = x @ w + b      (used for the packed qkv projection)
# ----------------------------------------------------------------------------

def _linear_kernel(x_ref, w_ref, b_ref, o_ref, acc_ref):
    @pl.when(pl.program_id(2) == 0)
    def _():
        acc_ref[...] = jnp.zeros_like(acc_ref)

    acc_ref[...] += jnp.dot(x_ref[...], w_ref[...],
                            preferred_element_type=jnp.float32)

    @pl.when(pl.program_id(2) == pl.num_programs(2) - 1)
    def _():
        o_ref[...] = (acc_ref[...] + b_ref[...]).astype(o_ref.dtype)


def linear(x, w, b):
    """x: (N, K) bf16, w: (K, M) bf16 (already transposed vs. torch), b: (M,) f32."""
    N, K = x.shape
    _, M = w.shape
    tm = _pick_tile(N, _TM, 16)          # 16-aligned: bf16 packs 16 rows per vreg
    tn = _pick_tile(M, _TN, 128)
    tk = _pick_tile(K, _TK, 128)
    cost = pl.CostEstimate(flops=2 * N * K * M, transcendentals=0,
                           bytes_accessed=2 * (N * K + K * M + N * M) + 4 * M)
    return pl.pallas_call(
        _linear_kernel,
        out_shape=jax.ShapeDtypeStruct((N, M), x.dtype),
        grid=(N // tm, M // tn, K // tk),
        in_specs=[
            pl.BlockSpec((tm, tk), lambda i, j, k: (i, k)),
            pl.BlockSpec((tk, tn), lambda i, j, k: (k, j)),
            pl.BlockSpec((1, tn), lambda i, j, k: (0, j)),
        ],
        out_specs=pl.BlockSpec((tm, tn), lambda i, j, k: (i, j)),
        scratch_shapes=[pltpu.VMEM((tm, tn), jnp.float32)],
        compiler_params=_compiler_params(("parallel", "parallel", "arbitrary")),
        cost_estimate=cost,
    )(x, w, b.reshape(1, M))


# ----------------------------------------------------------------------------
# Tiled linear with fused residual-add + LayerNorm epilogue (out_proj + LN1):
#   y = LayerNorm(residual + x @ w + b) * gamma + beta
# ----------------------------------------------------------------------------

def _linear_add_ln_kernel(x_ref, w_ref, b_ref, r_ref, g_ref, bt_ref,
                          o_ref, acc_ref, *, eps):
    @pl.when(pl.program_id(1) == 0)
    def _():
        acc_ref[...] = jnp.zeros_like(acc_ref)

    acc_ref[...] += jnp.dot(x_ref[...], w_ref[...],
                            preferred_element_type=jnp.float32)

    @pl.when(pl.program_id(1) == pl.num_programs(1) - 1)
    def _():
        y = acc_ref[...] + b_ref[...] + r_ref[...].astype(jnp.float32)
        # one-pass LayerNorm statistics: var = E[y^2] - mu^2
        mu = jnp.mean(y, axis=-1, keepdims=True)
        var = jnp.mean(y * y, axis=-1, keepdims=True) - mu * mu
        y = (y - mu) * jax.lax.rsqrt(var + eps)
        o_ref[...] = (y * g_ref[...] + bt_ref[...]).astype(o_ref.dtype)


def linear_add_ln(x, w, b, residual, gamma, beta, *, eps=1e-5):
    N, K = x.shape
    _, M = w.shape
    tk = _pick_tile(K, _TK, 128)
    # row-resident VMEM: acc (4M f32) + residual/out (bf16, double-buffered) + x tile
    tm = _row_tile(N, 4 * M + 4 * M + 4 * M + 4 * tk)
    cost = pl.CostEstimate(flops=2 * N * K * M + 8 * N * M, transcendentals=N,
                           bytes_accessed=2 * (N * K + K * M + 2 * N * M) + 16 * M)
    kern = functools.partial(_linear_add_ln_kernel, eps=eps)
    return pl.pallas_call(
        kern,
        out_shape=jax.ShapeDtypeStruct((N, M), x.dtype),
        grid=(N // tm, K // tk),
        in_specs=[
            pl.BlockSpec((tm, tk), lambda i, k: (i, k)),
            pl.BlockSpec((tk, M), lambda i, k: (k, 0)),
            pl.BlockSpec((1, M), lambda i, k: (0, 0)),
            pl.BlockSpec((tm, M), lambda i, k: (i, 0)),
            pl.BlockSpec((1, M), lambda i, k: (0, 0)),
            pl.BlockSpec((1, M), lambda i, k: (0, 0)),
        ],
        out_specs=pl.BlockSpec((tm, M), lambda i, k: (i, 0)),
        scratch_shapes=[pltpu.VMEM((tm, M), jnp.float32)],
        compiler_params=_compiler_params(("parallel", "arbitrary")),
        cost_estimate=cost,
    )(x, w, b.reshape(1, M), residual, gamma.reshape(1, M), beta.reshape(1, M))


# ----------------------------------------------------------------------------
# Fully fused feed-forward block (linear1 + ReLU + linear2 + residual + LN2):
#   y = LayerNorm(x + ReLU(x @ w1 + b1) @ w2 + b2) * gamma + beta
# The (N, hidden) activation lives only as (tm, th) tiles in VMEM.
# ----------------------------------------------------------------------------

def _ffn_kernel(x_ref, w1_ref, b1_ref, w2_ref, b2_ref, g_ref, bt_ref,
                o_ref, acc_ref, *, eps):
    @pl.when(pl.program_id(1) == 0)
    def _():
        acc_ref[...] = jnp.zeros_like(acc_ref)

    h = jnp.dot(x_ref[...], w1_ref[...], preferred_element_type=jnp.float32)
    h = jnp.maximum(h + b1_ref[...], 0.0)
    acc_ref[...] += jnp.dot(h.astype(w2_ref.dtype), w2_ref[...],
                            preferred_element_type=jnp.float32)

    @pl.when(pl.program_id(1) == pl.num_programs(1) - 1)
    def _():
        y = acc_ref[...] + b2_ref[...] + x_ref[...].astype(jnp.float32)   # residual = FFN input
        mu = jnp.mean(y, axis=-1, keepdims=True)
        var = jnp.mean(y * y, axis=-1, keepdims=True) - mu * mu
        y = (y - mu) * jax.lax.rsqrt(var + eps)
        o_ref[...] = (y * g_ref[...] + bt_ref[...]).astype(o_ref.dtype)


def ffn_fused(x, w1, b1, w2, b2, gamma, beta, *, eps=1e-5):
    N, E = x.shape
    _, HID = w1.shape
    th = _pick_tile(HID, _TK, 128)
    # row-resident VMEM: acc (4E f32) + x (bf16 dbuf) + out (bf16 dbuf) + hidden tile
    tm = _row_tile(N, 4 * E + 4 * E + 4 * E + 4 * th)
    cost = pl.CostEstimate(flops=4 * N * E * HID + 8 * N * E, transcendentals=N,
                           bytes_accessed=2 * (2 * N * E + 2 * E * HID) + 4 * (HID + 4 * E))
    kern = functools.partial(_ffn_kernel, eps=eps)
    return pl.pallas_call(
        kern,
        out_shape=jax.ShapeDtypeStruct((N, E), x.dtype),
        grid=(N // tm, HID // th),
        in_specs=[
            pl.BlockSpec((tm, E), lambda i, j: (i, 0)),
            pl.BlockSpec((E, th), lambda i, j: (0, j)),
            pl.BlockSpec((1, th), lambda i, j: (0, j)),
            pl.BlockSpec((th, E), lambda i, j: (j, 0)),
            pl.BlockSpec((1, E), lambda i, j: (0, 0)),
            pl.BlockSpec((1, E), lambda i, j: (0, 0)),
            pl.BlockSpec((1, E), lambda i, j: (0, 0)),
        ],
        out_specs=pl.BlockSpec((tm, E), lambda i, j: (i, 0)),
        scratch_shapes=[pltpu.VMEM((tm, E), jnp.float32)],
        compiler_params=_compiler_params(("parallel", "arbitrary")),
        cost_estimate=cost,
    )(x, w1, b1.reshape(1, HID), w2, b2.reshape(1, E),
      gamma.reshape(1, E), beta.reshape(1, E))


# ----------------------------------------------------------------------------
# Flash-style multi-head self attention (online softmax, KV tiled)
# ----------------------------------------------------------------------------

def _flash_kernel(q_ref, k_ref, v_ref, o_ref, m_ref, l_ref, acc_ref, *, scale):
    kv = pl.program_id(3)

    @pl.when(kv == 0)
    def _():
        m_ref[...] = jnp.full(m_ref.shape, -jnp.inf, dtype=jnp.float32)
        l_ref[...] = jnp.zeros_like(l_ref)
        acc_ref[...] = jnp.zeros_like(acc_ref)

    # fold 1/sqrt(head_dim) into q (tq*Dh mults instead of tq*tk on the scores)
    q = (q_ref[0, 0].astype(jnp.float32) * scale).astype(k_ref.dtype)
    # q @ k^T without materializing a transpose: contract the last dims on the MXU
    s = jax.lax.dot_general(q, k_ref[0, 0], (((1,), (1,)), ((), ())),
                            preferred_element_type=jnp.float32)        # (tq, tk) f32

    m_prev = m_ref[...]
    m_new = jnp.maximum(m_prev, jnp.max(s, axis=-1, keepdims=True))
    alpha = jnp.exp(m_prev - m_new)
    p = jnp.exp(s - m_new)
    l_ref[...] = alpha * l_ref[...] + jnp.sum(p, axis=-1, keepdims=True)
    acc_ref[...] = alpha * acc_ref[...] + jnp.dot(p.astype(v_ref.dtype), v_ref[0, 0],
                                                  preferred_element_type=jnp.float32)
    m_ref[...] = m_new

    @pl.when(kv == pl.num_programs(3) - 1)
    def _():
        o_ref[0, 0] = (acc_ref[...] *
                       pl.reciprocal(l_ref[...], approx=True)).astype(o_ref.dtype)


def flash_attention(q, k, v):
    """q, k, v: (B, H, S, Dh) bf16 -> (B, H, S, Dh).  VMEM footprint O(tq*tk)."""
    B, H, S, Dh = q.shape
    tq = _pick_tile(S, 512, 16)
    tk = _pick_tile(S, 512, 128)
    scale = 1.0 / math.sqrt(Dh)
    cost = pl.CostEstimate(flops=4 * B * H * S * S * Dh,
                           transcendentals=B * H * S * S,
                           bytes_accessed=8 * B * H * S * Dh)
    kern = functools.partial(_flash_kernel, scale=scale)
    # TODO(synk): when head_dim >= 128, process lane-aligned head groups per block
    # to fill the 256-wide MXU on the p@v matmul and keep stores unmasked.
    return pl.pallas_call(
        kern,
        out_shape=jax.ShapeDtypeStruct((B, H, S, Dh), q.dtype),
        grid=(B, H, S // tq, S // tk),
        in_specs=[
            pl.BlockSpec((1, 1, tq, Dh), lambda b, h, qi, ki: (b, h, qi, 0)),
            pl.BlockSpec((1, 1, tk, Dh), lambda b, h, qi, ki: (b, h, ki, 0)),
            pl.BlockSpec((1, 1, tk, Dh), lambda b, h, qi, ki: (b, h, ki, 0)),
        ],
        out_specs=pl.BlockSpec((1, 1, tq, Dh), lambda b, h, qi, ki: (b, h, qi, 0)),
        scratch_shapes=[pltpu.VMEM((tq, 1), jnp.float32),
                        pltpu.VMEM((tq, 1), jnp.float32),
                        pltpu.VMEM((tq, Dh), jnp.float32)],
        compiler_params=_compiler_params(
            ("parallel", "parallel", "parallel", "arbitrary")),
        cost_estimate=cost,
    )(q, k, v)


# ----------------------------------------------------------------------------
# Transformer encoder layer (post-norm, ReLU FFN — PyTorch defaults, eval mode)
# ----------------------------------------------------------------------------

def encoder_layer(x, p, num_heads):
    """x: (B, S, E) -> (B, S, E)."""
    B, S, E = x.shape
    H = num_heads
    Dh = E // H
    xf = x.reshape(B * S, E)

    # --- self attention: packed qkv projection -> flash attention -> out_proj + add&LN1
    qkv = linear(xf, p["in_proj_w"], p["in_proj_b"])                   # (B*S, 3E)
    # Head split as XLA glue (one transpose pass) so the flash kernel gets clean
    # (tq, Dh)/(tk, Dh) blocks whose minor dim equals the full array dim.
    # TODO(synk): fuse the head split into the in_proj epilogue (write (3,B,H,S,Dh)
    # straight out of the matmul) to save this HBM pass.
    qkv = qkv.reshape(B, S, 3, H, Dh)
    q, k, v = (jnp.transpose(qkv[:, :, i], (0, 2, 1, 3)) for i in range(3))  # (B,H,S,Dh)
    ao = flash_attention(q, k, v)                                      # (B, H, S, Dh)
    ao = jnp.transpose(ao, (0, 2, 1, 3)).reshape(B * S, E)             # head merge (glue)
    y1 = linear_add_ln(ao, p["out_proj_w"], p["out_proj_b"],
                       xf, p["ln1_g"], p["ln1_b"])                     # LN1(x + attn)

    # --- feed forward, fully fused (hidden activation never hits HBM)
    y2 = ffn_fused(y1, p["lin1_w"], p["lin1_b"], p["lin2_w"], p["lin2_b"],
                   p["ln2_g"], p["ln2_b"])                             # LN2(y1 + ff)
    return y2.reshape(B, S, E)


def transformer_model(src_ids, params, num_heads):
    """src_ids: (S, B) int32 token ids -> (S, B, E) float32 (PyTorch layout)."""
    # Embedding lookup: XLA gather glue (no clean simple Pallas equivalent).
    # Index with src_ids.T so activations are (B, S, E) inside the layers.
    x = jnp.take(params["emb"], src_ids.T, axis=0)                     # (B, S, E) bf16
    for lp in params["layers"]:
        x = encoder_layer(x, lp, num_heads)
    return x.transpose(1, 0, 2).astype(jnp.float32)                    # (S, B, E) f32


# ----------------------------------------------------------------------------
# Deterministic parameter init (synthetic weights, no checkpoint)
# ----------------------------------------------------------------------------

def init_params(key, vocab_size, emb_size, hidden_dim_size, num_layers):
    wdt = jnp.bfloat16   # MXU operand dtype; biases / LN params stay f32
    keys = jax.random.split(key, 1 + num_layers)
    params = {"emb": jax.random.normal(keys[0], (vocab_size, emb_size),
                                       jnp.float32).astype(wdt)}
    std = 0.02
    layers = []
    for l in range(num_layers):
        k = jax.random.split(keys[1 + l], 4)
        layers.append(dict(
            in_proj_w=(jax.random.normal(k[0], (emb_size, 3 * emb_size)) * std
                       ).astype(wdt),
            in_proj_b=jnp.zeros((3 * emb_size,), jnp.float32),
            out_proj_w=(jax.random.normal(k[1], (emb_size, emb_size)) * std
                        ).astype(wdt),
            out_proj_b=jnp.zeros((emb_size,), jnp.float32),
            lin1_w=(jax.random.normal(k[2], (emb_size, hidden_dim_size)) * std
                    ).astype(wdt),
            lin1_b=jnp.zeros((hidden_dim_size,), jnp.float32),
            lin2_w=(jax.random.normal(k[3], (hidden_dim_size, emb_size)) * std
                    ).astype(wdt),
            lin2_b=jnp.zeros((emb_size,), jnp.float32),
            ln1_g=jnp.ones((emb_size,), jnp.float32),
            ln1_b=jnp.zeros((emb_size,), jnp.float32),
            ln2_g=jnp.ones((emb_size,), jnp.float32),
            ln2_b=jnp.zeros((emb_size,), jnp.float32),
        ))
    params["layers"] = layers
    return params


# ----------------------------------------------------------------------------

if __name__ == "__main__":
    # Small, module-consistent config
    VOCAB, EMB, HEADS, HIDDEN, LAYERS = 50, 32, 4, 64, 2
    SEQ, BATCH = 8, 2

    key = jax.random.PRNGKey(0)
    k_param, k_src = jax.random.split(key)

    params = init_params(k_param, VOCAB, EMB, HIDDEN, LAYERS)
    src = jax.random.randint(k_src, (SEQ, BATCH), 0, VOCAB, dtype=jnp.int32)

    fwd = jax.jit(functools.partial(transformer_model, num_heads=HEADS))
    out = jax.block_until_ready(fwd(src, params))

    assert out.shape == (SEQ, BATCH, EMB)
    assert out.dtype == jnp.float32
    assert bool(jnp.all(jnp.isfinite(out)))
    print("KERNEL_OK")
</pallas_src>

<mosaic_0001>
module attributes {stable_mosaic.version = 11 : i64} {
  func.func @_linear_kernel(%arg0: i32, %arg1: i32, %arg2: i32, %arg3: memref<16x32xbf16, #tpu.memory_space<vmem>>, %arg4: memref<32x96xbf16, #tpu.memory_space<vmem>>, %arg5: memref<1x96xf32, #tpu.memory_space<vmem>>, %arg6: memref<16x96xbf16, #tpu.memory_space<vmem>>, %arg7: memref<16x96xf32, #tpu.memory_space<vmem>>) attributes {dimension_semantics = [#tpu.dimension_semantics<parallel>, #tpu.dimension_semantics<parallel>, #tpu.dimension_semantics<arbitrary>], iteration_bounds = array<i64: 1, 1, 1>, scalar_prefetch = 0 : i64, scratch_operands = 1 : i64, tpu.core_type = #tpu.core_type<tc>, window_params = [{transform_indices = @transform_0, window_bounds = array<i64: 16, 32>}, {transform_indices = @transform_1, window_bounds = array<i64: 32, 96>}, {transform_indices = @transform_2, window_bounds = array<i64: 1, 96>}, {transform_indices = @transform_3, window_bounds = array<i64: 16, 96>}]} {
    %c0_i32 = arith.constant 0 : i32
    %0 = arith.cmpi eq, %arg2, %c0_i32 : i32
    %1 = arith.extui %0 : i1 to i32
    %c0_i32_0 = arith.constant 0 : i32
    %2 = arith.cmpi ne, %1, %c0_i32_0 : i32
    scf.if %2 {
      %cst_10 = arith.constant 0.000000e+00 : f32
      %12 = vector.broadcast %cst_10 : f32 to vector<16x96xf32>
      %c0_11 = arith.constant 0 : index
      %c0_12 = arith.constant 0 : index
      %13 = vector.load %arg7[%c0_11, %c0_12] : memref<16x96xf32, #tpu.memory_space<vmem>>, vector<16x96xf32>
      tpu.vector_store %arg7[%c0_11, %c0_12], %12 {strides = array<i32>} : memref<16x96xf32, #tpu.memory_space<vmem>>, vector<16x96xf32>,
    } else {
    }
    %c0 = arith.constant 0 : index
    %c0_1 = arith.constant 0 : index
    %3 = vector.load %arg7[%c0, %c0_1] : memref<16x96xf32, #tpu.memory_space<vmem>>, vector<16x96xf32>
    %c0_2 = arith.constant 0 : index
    %c0_3 = arith.constant 0 : index
    %4 = vector.load %arg3[%c0_2, %c0_3] : memref<16x32xbf16, #tpu.memory_space<vmem>>, vector<16x32xbf16>
    %c0_4 = arith.constant 0 : index
    %c0_5 = arith.constant 0 : index
    %5 = vector.load %arg4[%c0_4, %c0_5] : memref<32x96xbf16, #tpu.memory_space<vmem>>, vector<32x96xbf16>
    %cst = arith.constant dense<0.000000e+00> : vector<16x96xf32>
    %6 = tpu.matmul %4, %5, %cst {dimension_numbers = #tpu.dot_dimension_numbers<[1], [0], [0], [1], [0, 0, 1, 1], [], []>} : vector<16x32xbf16>, vector<32x96xbf16>, vector<16x96xf32> -> vector<16x96xf32>
    %7 = arith.addf %3, %6 : vector<16x96xf32>
    %c0_6 = arith.constant 0 : index
    %c0_7 = arith.constant 0 : index
    %8 = vector.load %arg7[%c0_6, %c0_7] : memref<16x96xf32, #tpu.memory_space<vmem>>, vector<16x96xf32>
    tpu.vector_store %arg7[%c0_6, %c0_7], %7 {strides = array<i32>} : memref<16x96xf32, #tpu.memory_space<vmem>>, vector<16x96xf32>,
    %c0_i32_8 = arith.constant 0 : i32
    %9 = arith.cmpi eq, %arg2, %c0_i32_8 : i32
    %10 = arith.extui %9 : i1 to i32
    %c0_i32_9 = arith.constant 0 : i32
    %11 = arith.cmpi ne, %10, %c0_i32_9 : i32
    scf.if %11 {
      %c0_10 = arith.constant 0 : index
      %c0_11 = arith.constant 0 : index
      %12 = vector.load %arg7[%c0_10, %c0_11] : memref<16x96xf32, #tpu.memory_space<vmem>>, vector<16x96xf32>
      %c0_12 = arith.constant 0 : index
      %c0_13 = arith.constant 0 : index
      %13 = vector.load %arg5[%c0_12, %c0_13] : memref<1x96xf32, #tpu.memory_space<vmem>>, vector<1x96xf32>
      %14 = vector.broadcast %13 : vector<1x96xf32> to vector<16x96xf32>
      %15 = arith.addf %12, %14 : vector<16x96xf32>
      %16 = arith.truncf %15 : vector<16x96xf32> to vector<16x96xbf16>
      %c0_14 = arith.constant 0 : index
      %c0_15 = arith.constant 0 : index
      %17 = vector.load %arg6[%c0_14, %c0_15] : memref<16x96xbf16, #tpu.memory_space<vmem>>, vector<16x96xbf16>
      tpu.vector_store %arg6[%c0_14, %c0_15], %16 {strides = array<i32>} : memref<16x96xbf16, #tpu.memory_space<vmem>>, vector<16x96xbf16>,
    } else {
    }
    return
  }
  func.func @transform_0(%arg0: i32, %arg1: i32, %arg2: i32) -> (i32, i32) {
    %c0_i32 = arith.constant 0 : i32
    return %arg0, %arg2 : i32, i32
  }
  func.func @transform_1(%arg0: i32, %arg1: i32, %arg2: i32) -> (i32, i32) {
    %c0_i32 = arith.constant 0 : i32
    return %arg2, %arg1 : i32, i32
  }
  func.func @transform_2(%arg0: i32, %arg1: i32, %arg2: i32) -> (i32, i32) {
    %c0_i32 = arith.constant 0 : i32
    %c0_i32_0 = arith.constant 0 : i32
    return %c0_i32, %arg1 : i32, i32
  }
  func.func @transform_3(%arg0: i32, %arg1: i32, %arg2: i32) -> (i32, i32) {
    %c0_i32 = arith.constant 0 : i32
    return %arg0, %arg1 : i32, i32
  }
}

module attributes {stable_mosaic.version = 11 : i64} {
  func.func @_linear_add_ln_kernel(%arg0: i32, %arg1: i32, %arg2: memref<16x32xbf16, #tpu.memory_space<vmem>>, %arg3: memref<32x32xbf16, #tpu.memory_space<vmem>>, %arg4: memref<1x32xf32, #tpu.memory_space<vmem>>, %arg5: memref<16x32xbf16, #tpu.memory_space<vmem>>, %arg6: memref<1x32xf32, #tpu.memory_space<vmem>>, %arg7: memref<1x32xf32, #tpu.memory_space<vmem>>, %arg8: memref<16x32xbf16, #tpu.memory_space<vmem>>, %arg9: memref<16x32xf32, #tpu.memory_space<vmem>>) attributes {dimension_semantics = [#tpu.dimension_semantics<parallel>, #tpu.dimension_semantics<arbitrary>], iteration_bounds = array<i64: 1, 1>, scalar_prefetch = 0 : i64, scratch_operands = 1 : i64, tpu.core_type = #tpu.core_type<tc>, window_params = [{transform_indices = @transform_0, window_bounds = array<i64: 16, 32>}, {transform_indices = @transform_1, window_bounds = array<i64: 32, 32>}, {pipeline_mode = #tpu.pipeline_mode<synchronous>, transform_indices = @transform_2, window_bounds = array<i64: 1, 32>}, {transform_indices = @transform_3, window_bounds = array<i64: 16, 32>}, {pipeline_mode = #tpu.pipeline_mode<synchronous>, transform_indices = @transform_4, window_bounds = array<i64: 1, 32>}, {pipeline_mode = #tpu.pipeline_mode<synchronous>, transform_indices = @transform_5, window_bounds = array<i64: 1, 32>}, {transform_indices = @transform_6, window_bounds = array<i64: 16, 32>}]} {
    %c0_i32 = arith.constant 0 : i32
    %0 = arith.cmpi eq, %arg1, %c0_i32 : i32
    %1 = arith.extui %0 : i1 to i32
    %c0_i32_0 = arith.constant 0 : i32
    %2 = arith.cmpi ne, %1, %c0_i32_0 : i32
    scf.if %2 {
      %cst_10 = arith.constant 0.000000e+00 : f32
      %12 = vector.broadcast %cst_10 : f32 to vector<16x32xf32>
      %c0_11 = arith.constant 0 : index
      %c0_12 = arith.constant 0 : index
      %13 = vector.load %arg9[%c0_11, %c0_12] : memref<16x32xf32, #tpu.memory_space<vmem>>, vector<16x32xf32>
      tpu.vector_store %arg9[%c0_11, %c0_12], %12 {strides = array<i32>} : memref<16x32xf32, #tpu.memory_space<vmem>>, vector<16x32xf32>,
    } else {
    }
    %c0 = arith.constant 0 : index
    %c0_1 = arith.constant 0 : index
    %3 = vector.load %arg9[%c0, %c0_1] : memref<16x32xf32, #tpu.memory_space<vmem>>, vector<16x32xf32>
    %c0_2 = arith.constant 0 : index
    %c0_3 = arith.constant 0 : index
    %4 = vector.load %arg2[%c0_2, %c0_3] : memref<16x32xbf16, #tpu.memory_space<vmem>>, vector<16x32xbf16>
    %c0_4 = arith.constant 0 : index
    %c0_5 = arith.constant 0 : index
    %5 = vector.load %arg3[%c0_4, %c0_5] : memref<32x32xbf16, #tpu.memory_space<vmem>>, vector<32x32xbf16>
    %cst = arith.constant dense<0.000000e+00> : vector<16x32xf32>
    %6 = tpu.matmul %4, %5, %cst {dimension_numbers = #tpu.dot_dimension_numbers<[1], [0], [0], [1], [0, 0, 1, 1], [], []>} : vector<16x32xbf16>, vector<32x32xbf16>, vector<16x32xf32> -> vector<16x32xf32>
    %7 = arith.addf %3, %6 : vector<16x32xf32>
    %c0_6 = arith.constant 0 : index
    %c0_7 = arith.constant 0 : index
    %8 = vector.load %arg9[%c0_6, %c0_7] : memref<16x32xf32, #tpu.memory_space<vmem>>, vector<16x32xf32>
    tpu.vector_store %arg9[%c0_6, %c0_7], %7 {strides = array<i32>} : memref<16x32xf32, #tpu.memory_space<vmem>>, vector<16x32xf32>,
    %c0_i32_8 = arith.constant 0 : i32
    %9 = arith.cmpi eq, %arg1, %c0_i32_8 : i32
    %10 = arith.extui %9 : i1 to i32
    %c0_i32_9 = arith.constant 0 : i32
    %11 = arith.cmpi ne, %10, %c0_i32_9 : i32
    scf.if %11 {
      %c0_10 = arith.constant 0 : index
      %c0_11 = arith.constant 0 : index
      %12 = vector.load %arg9[%c0_10, %c0_11] : memref<16x32xf32, #tpu.memory_space<vmem>>, vector<16x32xf32>
      %c0_12 = arith.constant 0 : index
      %c0_13 = arith.constant 0 : index
      %13 = vector.load %arg4[%c0_12, %c0_13] : memref<1x32xf32, #tpu.memory_space<vmem>>, vector<1x32xf32>
      %14 = vector.broadcast %13 : vector<1x32xf32> to vector<16x32xf32>
      %15 = arith.addf %12, %14 : vector<16x32xf32>
      %c0_14 = arith.constant 0 : index
      %c0_15 = arith.constant 0 : index
      %16 = vector.load %arg5[%c0_14, %c0_15] : memref<16x32xbf16, #tpu.memory_space<vmem>>, vector<16x32xbf16>
      %17 = arith.extf %16 : vector<16x32xbf16> to vector<16x32xf32>
      %18 = arith.addf %15, %17 : vector<16x32xf32>
      %cst_16 = arith.constant dense<0.000000e+00> : vector<16xf32>
      %19 = vector.multi_reduction <add>, %18, %cst_16 [1] : vector<16x32xf32> to vector<16xf32>
      %20 = vector.shape_cast %19 : vector<16xf32> to vector<16x1xf32>
      %cst_17 = arith.constant 3.200000e+01 : f32
      %21 = vector.broadcast %cst_17 : f32 to vector<16x1xf32>
      %22 = arith.divf %20, %21 : vector<16x1xf32>
      %23 = arith.mulf %18, %18 : vector<16x32xf32>
      %cst_18 = arith.constant dense<0.000000e+00> : vector<16xf32>
      %24 = vector.multi_reduction <add>, %23, %cst_18 [1] : vector<16x32xf32> to vector<16xf32>
      %25 = vector.shape_cast %24 : vector<16xf32> to vector<16x1xf32>
      %cst_19 = arith.constant 3.200000e+01 : f32
      %26 = vector.broadcast %cst_19 : f32 to vector<16x1xf32>
      %27 = arith.divf %25, %26 : vector<16x1xf32>
      %28 = arith.mulf %22, %22 : vector<16x1xf32>
      %29 = arith.subf %27, %28 : vector<16x1xf32>
      %30 = vector.broadcast %22 : vector<16x1xf32> to vector<16x32xf32>
      %31 = arith.subf %18, %30 : vector<16x32xf32>
      %cst_20 = arith.constant 9.99999974E-6 : f32
      %32 = vector.broadcast %cst_20 : f32 to vector<16x1xf32>
      %33 = arith.addf %29, %32 : vector<16x1xf32>
      %34 = math.rsqrt %33 : vector<16x1xf32>
      %35 = vector.broadcast %34 : vector<16x1xf32> to vector<16x32xf32>
      %36 = arith.mulf %31, %35 : vector<16x32xf32>
      %c0_21 = arith.constant 0 : index
      %c0_22 = arith.constant 0 : index
      %37 = vector.load %arg6[%c0_21, %c0_22] : memref<1x32xf32, #tpu.memory_space<vmem>>, vector<1x32xf32>
      %38 = vector.broadcast %37 : vector<1x32xf32> to vector<16x32xf32>
      %39 = arith.mulf %36, %38 : vector<16x32xf32>
      %c0_23 = arith.constant 0 : index
      %c0_24 = arith.constant 0 : index
      %40 = vector.load %arg7[%c0_23, %c0_24] : memref<1x32xf32, #tpu.memory_space<vmem>>, vector<1x32xf32>
      %41 = vector.broadcast %40 : vector<1x32xf32> to vector<16x32xf32>
      %42 = arith.addf %39, %41 : vector<16x32xf32>
      %43 = arith.truncf %42 : vector<16x32xf32> to vector<16x32xbf16>
      %c0_25 = arith.constant 0 : index
      %c0_26 = arith.constant 0 : index
      %44 = vector.load %arg8[%c0_25, %c0_26] : memref<16x32xbf16, #tpu.memory_space<vmem>>, vector<16x32xbf16>
      tpu.vector_store %arg8[%c0_25, %c0_26], %43 {strides = array<i32>} : memref<16x32xbf16, #tpu.memory_space<vmem>>, vector<16x32xbf16>,
    } else {
    }
    return
  }
  func.func @transform_0(%arg0: i32, %arg1: i32) -> (i32, i32) {
    %c0_i32 = arith.constant 0 : i32
    return %arg0, %arg1 : i32, i32
  }
  func.func @transform_1(%arg0: i32, %arg1: i32) -> (i32, i32) {
    %c0_i32 = arith.constant 0 : i32
    %c0_i32_0 = arith.constant 0 : i32
    return %arg1, %c0_i32 : i32, i32
  }
  func.func @transform_2(%arg0: i32, %arg1: i32) -> (i32, i32) {
    %c0_i32 = arith.constant 0 : i32
    %c0_i32_0 = arith.constant 0 : i32
    %c0_i32_1 = arith.constant 0 : i32
    return %c0_i32, %c0_i32_0 : i32, i32
  }
  func.func @transform_3(%arg0: i32, %arg1: i32) -> (i32, i32) {
    %c0_i32 = arith.constant 0 : i32
    %c0_i32_0 = arith.constant 0 : i32
    return %arg0, %c0_i32 : i32, i32
  }
  func.func @transform_4(%arg0: i32, %arg1: i32) -> (i32, i32) {
    %c0_i32 = arith.constant 0 : i32
    %c0_i32_0 = arith.constant 0 : i32
    %c0_i32_1 = arith.constant 0 : i32
    return %c0_i32, %c0_i32_0 : i32, i32
  }
  func.func @transform_5(%arg0: i32, %arg1: i32) -> (i32, i32) {
    %c0_i32 = arith.constant 0 : i32
    %c0_i32_0 = arith.constant 0 : i32
    %c0_i32_1 = arith.constant 0 : i32
    return %c0_i32, %c0_i32_0 : i32, i32
  }
  func.func @transform_6(%arg0: i32, %arg1: i32) -> (i32, i32) {
    %c0_i32 = arith.constant 0 : i32
    %c0_i32_0 = arith.constant 0 : i32
    return %arg0, %c0_i32 : i32, i32
  }
}

module attributes {stable_mosaic.version = 11 : i64} {
  func.func @_flash_kernel(%arg0: i32, %arg1: i32, %arg2: i32, %arg3: i32, %arg4: memref<1x1x8x8xbf16, #tpu.memory_space<vmem>>, %arg5: memref<1x1x8x8xbf16, #tpu.memory_space<vmem>>, %arg6: memref<1x1x8x8xbf16, #tpu.memory_space<vmem>>, %arg7: memref<1x1x8x8xbf16, #tpu.memory_space<vmem>>, %arg8: memref<8x1xf32, #tpu.memory_space<vmem>>, %arg9: memref<8x1xf32, #tpu.memory_space<vmem>>, %arg10: memref<8x8xf32, #tpu.memory_space<vmem>>) attributes {dimension_semantics = [#tpu.dimension_semantics<parallel>, #tpu.dimension_semantics<parallel>, #tpu.dimension_semantics<parallel>, #tpu.dimension_semantics<arbitrary>], iteration_bounds = array<i64: 2, 4, 1, 1>, scalar_prefetch = 0 : i64, scratch_operands = 3 : i64, tpu.core_type = #tpu.core_type<tc>, window_params = [{transform_indices = @transform_0, window_bounds = array<i64: 1, 1, 8, 8>}, {transform_indices = @transform_1, window_bounds = array<i64: 1, 1, 8, 8>}, {transform_indices = @transform_2, window_bounds = array<i64: 1, 1, 8, 8>}, {transform_indices = @transform_3, window_bounds = array<i64: 1, 1, 8, 8>}]} {
    %c0_i32 = arith.constant 0 : i32
    %0 = arith.cmpi eq, %arg3, %c0_i32 : i32
    %1 = arith.extui %0 : i1 to i32
    %c0_i32_0 = arith.constant 0 : i32
    %2 = arith.cmpi ne, %1, %c0_i32_0 : i32
    scf.if %2 {
      %cst_30 = arith.constant 0xFF800000 : f32
      %40 = vector.broadcast %cst_30 : f32 to vector<8x1xf32>
      %c0_31 = arith.constant 0 : index
      %c0_32 = arith.constant 0 : index
      %41 = vector.load %arg8[%c0_31, %c0_32] : memref<8x1xf32, #tpu.memory_space<vmem>>, vector<8x1xf32>
      tpu.vector_store %arg8[%c0_31, %c0_32], %40 {strides = array<i32>} : memref<8x1xf32, #tpu.memory_space<vmem>>, vector<8x1xf32>,
      %cst_33 = arith.constant 0.000000e+00 : f32
      %42 = vector.broadcast %cst_33 : f32 to vector<8x1xf32>
      %c0_34 = arith.constant 0 : index
      %c0_35 = arith.constant 0 : index
      %43 = vector.load %arg9[%c0_34, %c0_35] : memref<8x1xf32, #tpu.memory_space<vmem>>, vector<8x1xf32>
      tpu.vector_store %arg9[%c0_34, %c0_35], %42 {strides = array<i32>} : memref<8x1xf32, #tpu.memory_space<vmem>>, vector<8x1xf32>,
      %cst_36 = arith.constant 0.000000e+00 : f32
      %44 = vector.broadcast %cst_36 : f32 to vector<8x8xf32>
      %c0_37 = arith.constant 0 : index
      %c0_38 = arith.constant 0 : index
      %45 = vector.load %arg10[%c0_37, %c0_38] : memref<8x8xf32, #tpu.memory_space<vmem>>, vector<8x8xf32>
      tpu.vector_store %arg10[%c0_37, %c0_38], %44 {strides = array<i32>} : memref<8x8xf32, #tpu.memory_space<vmem>>, vector<8x8xf32>,
    } else {
    }
    %c0 = arith.constant 0 : index
    %c0_1 = arith.constant 0 : index
    %c0_2 = arith.constant 0 : index
    %c0_3 = arith.constant 0 : index
    %3 = vector.load %arg4[%c0, %c0_1, %c0_2, %c0_3] : memref<1x1x8x8xbf16, #tpu.memory_space<vmem>>, vector<1x1x8x8xbf16>
    %4 = vector.shape_cast %3 : vector<1x1x8x8xbf16> to vector<8x8xbf16>
    %5 = arith.extf %4 : vector<8x8xbf16> to vector<8x8xf32>
    %cst = arith.constant 0.353553385 : f32
    %6 = vector.broadcast %cst : f32 to vector<8x8xf32>
    %7 = arith.mulf %5, %6 : vector<8x8xf32>
    %8 = arith.truncf %7 : vector<8x8xf32> to vector<8x8xbf16>
    %c0_4 = arith.constant 0 : index
    %c0_5 = arith.constant 0 : index
    %c0_6 = arith.constant 0 : index
    %c0_7 = arith.constant 0 : index
    %9 = vector.load %arg5[%c0_4, %c0_5, %c0_6, %c0_7] : memref<1x1x8x8xbf16, #tpu.memory_space<vmem>>, vector<1x1x8x8xbf16>
    %10 = vector.shape_cast %9 : vector<1x1x8x8xbf16> to vector<8x8xbf16>
    %cst_8 = arith.constant dense<0.000000e+00> : vector<8x8xf32>
    %11 = tpu.matmul %8, %10, %cst_8 {dimension_numbers = #tpu.dot_dimension_numbers<[1], [1], [0], [0], [0, 0, 1, 0], [], []>} : vector<8x8xbf16>, vector<8x8xbf16>, vector<8x8xf32> -> vector<8x8xf32>
    %c0_9 = arith.constant 0 : index
    %c0_10 = arith.constant 0 : index
    %12 = vector.load %arg8[%c0_9, %c0_10] : memref<8x1xf32, #tpu.memory_space<vmem>>, vector<8x1xf32>
    %cst_11 = arith.constant dense<0xFF800000> : vector<8xf32>
    %13 = vector.multi_reduction <maximumf>, %11, %cst_11 [1] : vector<8x8xf32> to vector<8xf32>
    %14 = vector.shape_cast %13 : vector<8xf32> to vector<8x1xf32>
    %15 = arith.maximumf %12, %14 : vector<8x1xf32>
    %16 = arith.subf %12, %15 : vector<8x1xf32>
    %17 = math.exp %16 : vector<8x1xf32>
    %18 = vector.broadcast %15 : vector<8x1xf32> to vector<8x8xf32>
    %19 = arith.subf %11, %18 : vector<8x8xf32>
    %20 = math.exp %19 : vector<8x8xf32>
    %c0_12 = arith.constant 0 : index
    %c0_13 = arith.constant 0 : index
    %21 = vector.load %arg9[%c0_12, %c0_13] : memref<8x1xf32, #tpu.memory_space<vmem>>, vector<8x1xf32>
    %22 = arith.mulf %17, %21 : vector<8x1xf32>
    %cst_14 = arith.constant dense<0.000000e+00> : vector<8xf32>
    %23 = vector.multi_reduction <add>, %20, %cst_14 [1] : vector<8x8xf32> to vector<8xf32>
    %24 = vector.shape_cast %23 : vector<8xf32> to vector<8x1xf32>
    %25 = arith.addf %22, %24 : vector<8x1xf32>
    %c0_15 = arith.constant 0 : index
    %c0_16 = arith.constant 0 : index
    %26 = vector.load %arg9[%c0_15, %c0_16] : memref<8x1xf32, #tpu.memory_space<vmem>>, vector<8x1xf32>
    tpu.vector_store %arg9[%c0_15, %c0_16], %25 {strides = array<i32>} : memref<8x1xf32, #tpu.memory_space<vmem>>, vector<8x1xf32>,
    %c0_17 = arith.constant 0 : index
    %c0_18 = arith.constant 0 : index
    %27 = vector.load %arg10[%c0_17, %c0_18] : memref<8x8xf32, #tpu.memory_space<vmem>>, vector<8x8xf32>
    %28 = vector.broadcast %17 : vector<8x1xf32> to vector<8x8xf32>
    %29 = arith.mulf %28, %27 : vector<8x8xf32>
    %30 = arith.truncf %20 : vector<8x8xf32> to vector<8x8xbf16>
    %c0_19 = arith.constant 0 : index
    %c0_20 = arith.constant 0 : index
    %c0_21 = arith.constant 0 : index
    %c0_22 = arith.constant 0 : index
    %31 = vector.load %arg6[%c0_19, %c0_20, %c0_21, %c0_22] : memref<1x1x8x8xbf16, #tpu.memory_space<vmem>>, vector<1x1x8x8xbf16>
    %32 = vector.shape_cast %31 : vector<1x1x8x8xbf16> to vector<8x8xbf16>
    %cst_23 = arith.constant dense<0.000000e+00> : vector<8x8xf32>
    %33 = tpu.matmul %30, %32, %cst_23 {dimension_numbers = #tpu.dot_dimension_numbers<[1], [0], [0], [1], [0, 0, 1, 1], [], []>} : vector<8x8xbf16>, vector<8x8xbf16>, vector<8x8xf32> -> vector<8x8xf32>
    %34 = arith.addf %29, %33 : vector<8x8xf32>
    %c0_24 = arith.constant 0 : index
    %c0_25 = arith.constant 0 : index
    %35 = vector.load %arg10[%c0_24, %c0_25] : memref<8x8xf32, #tpu.memory_space<vmem>>, vector<8x8xf32>
    tpu.vector_store %arg10[%c0_24, %c0_25], %34 {strides = array<i32>} : memref<8x8xf32, #tpu.memory_space<vmem>>, vector<8x8xf32>,
    %c0_26 = arith.constant 0 : index
    %c0_27 = arith.constant 0 : index
    %36 = vector.load %arg8[%c0_26, %c0_27] : memref<8x1xf32, #tpu.memory_space<vmem>>, vector<8x1xf32>
    tpu.vector_store %arg8[%c0_26, %c0_27], %15 {strides = array<i32>} : memref<8x1xf32, #tpu.memory_space<vmem>>, vector<8x1xf32>,
    %c0_i32_28 = arith.constant 0 : i32
    %37 = arith.cmpi eq, %arg3, %c0_i32_28 : i32
    %38 = arith.extui %37 : i1 to i32
    %c0_i32_29 = arith.constant 0 : i32
    %39 = arith.cmpi ne, %38, %c0_i32_29 : i32
    scf.if %39 {
      %c0_30 = arith.constant 0 : index
      %c0_31 = arith.constant 0 : index
      %40 = vector.load %arg10[%c0_30, %c0_31] : memref<8x8xf32, #tpu.memory_space<vmem>>, vector<8x8xf32>
      %c0_32 = arith.constant 0 : index
      %c0_33 = arith.constant 0 : index
      %41 = vector.load %arg9[%c0_32, %c0_33] : memref<8x1xf32, #tpu.memory_space<vmem>>, vector<8x1xf32>
      %42 = tpu.reciprocal %41 {approx = true} : vector<8x1xf32> -> vector<8x1xf32>
      %43 = vector.broadcast %42 : vector<8x1xf32> to vector<8x8xf32>
      %44 = arith.mulf %40, %43 : vector<8x8xf32>
      %45 = arith.truncf %44 : vector<8x8xf32> to vector<8x8xbf16>
      %c0_34 = arith.constant 0 : index
      %c0_35 = arith.constant 0 : index
      %c0_36 = arith.constant 0 : index
      %c0_37 = arith.constant 0 : index
      %46 = vector.load %arg7[%c0_34, %c0_35, %c0_36, %c0_37] : memref<1x1x8x8xbf16, #tpu.memory_space<vmem>>, vector<1x1x8x8xbf16>
      %47 = vector.shape_cast %46 : vector<1x1x8x8xbf16> to vector<8x8xbf16>
      %48 = vector.shape_cast %45 : vector<8x8xbf16> to vector<1x1x8x8xbf16>
      tpu.vector_store %arg7[%c0_34, %c0_35, %c0_36, %c0_37], %48 {strides = array<i32>} : memref<1x1x8x8xbf16, #tpu.memory_space<vmem>>, vector<1x1x8x8xbf16>,
    } else {
    }
    return
  }
  func.func @transform_0(%arg0: i32, %arg1: i32, %arg2: i32, %arg3: i32) -> (i32, i32, i32, i32) {
    %c0_i32 = arith.constant 0 : i32
    %c0_i32_0 = arith.constant 0 : i32
    return %arg0, %arg1, %arg2, %c0_i32 : i32, i32, i32, i32
  }
  func.func @transform_1(%arg0: i32, %arg1: i32, %arg2: i32, %arg3: i32) -> (i32, i32, i32, i32) {
    %c0_i32 = arith.constant 0 : i32
    %c0_i32_0 = arith.constant 0 : i32
    return %arg0, %arg1, %arg3, %c0_i32 : i32, i32, i32, i32
  }
  func.func @transform_2(%arg0: i32, %arg1: i32, %arg2: i32, %arg3: i32) -> (i32, i32, i32, i32) {
    %c0_i32 = arith.constant 0 : i32
    %c0_i32_0 = arith.constant 0 : i32
    return %arg0, %arg1, %arg3, %c0_i32 : i32, i32, i32, i32
  }
  func.func @transform_3(%arg0: i32, %arg1: i32, %arg2: i32, %arg3: i32) -> (i32, i32, i32, i32) {
    %c0_i32 = arith.constant 0 : i32
    %c0_i32_0 = arith.constant 0 : i32
    return %arg0, %arg1, %arg2, %c0_i32 : i32, i32, i32, i32
  }
}

module attributes {stable_mosaic.version = 11 : i64} {
  func.func @_ffn_kernel(%arg0: i32, %arg1: i32, %arg2: memref<16x32xbf16, #tpu.memory_space<vmem>>, %arg3: memref<32x64xbf16, #tpu.memory_space<vmem>>, %arg4: memref<1x64xf32, #tpu.memory_space<vmem>>, %arg5: memref<64x32xbf16, #tpu.memory_space<vmem>>, %arg6: memref<1x32xf32, #tpu.memory_space<vmem>>, %arg7: memref<1x32xf32, #tpu.memory_space<vmem>>, %arg8: memref<1x32xf32, #tpu.memory_space<vmem>>, %arg9: memref<16x32xbf16, #tpu.memory_space<vmem>>, %arg10: memref<16x32xf32, #tpu.memory_space<vmem>>) attributes {dimension_semantics = [#tpu.dimension_semantics<parallel>, #tpu.dimension_semantics<arbitrary>], iteration_bounds = array<i64: 1, 1>, scalar_prefetch = 0 : i64, scratch_operands = 1 : i64, tpu.core_type = #tpu.core_type<tc>, window_params = [{transform_indices = @transform_0, window_bounds = array<i64: 16, 32>}, {transform_indices = @transform_1, window_bounds = array<i64: 32, 64>}, {transform_indices = @transform_2, window_bounds = array<i64: 1, 64>}, {transform_indices = @transform_3, window_bounds = array<i64: 64, 32>}, {pipeline_mode = #tpu.pipeline_mode<synchronous>, transform_indices = @transform_4, window_bounds = array<i64: 1, 32>}, {pipeline_mode = #tpu.pipeline_mode<synchronous>, transform_indices = @transform_5, window_bounds = array<i64: 1, 32>}, {pipeline_mode = #tpu.pipeline_mode<synchronous>, transform_indices = @transform_6, window_bounds = array<i64: 1, 32>}, {transform_indices = @transform_7, window_bounds = array<i64: 16, 32>}]} {
    %c0_i32 = arith.constant 0 : i32
    %0 = arith.cmpi eq, %arg1, %c0_i32 : i32
    %1 = arith.extui %0 : i1 to i32
    %c0_i32_0 = arith.constant 0 : i32
    %2 = arith.cmpi ne, %1, %c0_i32_0 : i32
    scf.if %2 {
      %cst_16 = arith.constant 0.000000e+00 : f32
      %20 = vector.broadcast %cst_16 : f32 to vector<16x32xf32>
      %c0_17 = arith.constant 0 : index
      %c0_18 = arith.constant 0 : index
      %21 = vector.load %arg10[%c0_17, %c0_18] : memref<16x32xf32, #tpu.memory_space<vmem>>, vector<16x32xf32>
      tpu.vector_store %arg10[%c0_17, %c0_18], %20 {strides = array<i32>} : memref<16x32xf32, #tpu.memory_space<vmem>>, vector<16x32xf32>,
    } else {
    }
    %c0 = arith.constant 0 : index
    %c0_1 = arith.constant 0 : index
    %3 = vector.load %arg2[%c0, %c0_1] : memref<16x32xbf16, #tpu.memory_space<vmem>>, vector<16x32xbf16>
    %c0_2 = arith.constant 0 : index
    %c0_3 = arith.constant 0 : index
    %4 = vector.load %arg3[%c0_2, %c0_3] : memref<32x64xbf16, #tpu.memory_space<vmem>>, vector<32x64xbf16>
    %cst = arith.constant dense<0.000000e+00> : vector<16x64xf32>
    %5 = tpu.matmul %3, %4, %cst {dimension_numbers = #tpu.dot_dimension_numbers<[1], [0], [0], [1], [0, 0, 1, 1], [], []>} : vector<16x32xbf16>, vector<32x64xbf16>, vector<16x64xf32> -> vector<16x64xf32>
    %c0_4 = arith.constant 0 : index
    %c0_5 = arith.constant 0 : index
    %6 = vector.load %arg4[%c0_4, %c0_5] : memref<1x64xf32, #tpu.memory_space<vmem>>, vector<1x64xf32>
    %7 = vector.broadcast %6 : vector<1x64xf32> to vector<16x64xf32>
    %8 = arith.addf %5, %7 : vector<16x64xf32>
    %cst_6 = arith.constant 0.000000e+00 : f32
    %9 = vector.broadcast %cst_6 : f32 to vector<16x64xf32>
    %10 = arith.maximumf %8, %9 : vector<16x64xf32>
    %c0_7 = arith.constant 0 : index
    %c0_8 = arith.constant 0 : index
    %11 = vector.load %arg10[%c0_7, %c0_8] : memref<16x32xf32, #tpu.memory_space<vmem>>, vector<16x32xf32>
    %12 = arith.truncf %10 : vector<16x64xf32> to vector<16x64xbf16>
    %c0_9 = arith.constant 0 : index
    %c0_10 = arith.constant 0 : index
    %13 = vector.load %arg5[%c0_9, %c0_10] : memref<64x32xbf16, #tpu.memory_space<vmem>>, vector<64x32xbf16>
    %cst_11 = arith.constant dense<0.000000e+00> : vector<16x32xf32>
    %14 = tpu.matmul %12, %13, %cst_11 {dimension_numbers = #tpu.dot_dimension_numbers<[1], [0], [0], [1], [0, 0, 1, 1], [], []>} : vector<16x64xbf16>, vector<64x32xbf16>, vector<16x32xf32> -> vector<16x32xf32>
    %15 = arith.addf %11, %14 : vector<16x32xf32>
    %c0_12 = arith.constant 0 : index
    %c0_13 = arith.constant 0 : index
    %16 = vector.load %arg10[%c0_12, %c0_13] : memref<16x32xf32, #tpu.memory_space<vmem>>, vector<16x32xf32>
    tpu.vector_store %arg10[%c0_12, %c0_13], %15 {strides = array<i32>} : memref<16x32xf32, #tpu.memory_space<vmem>>, vector<16x32xf32>,
    %c0_i32_14 = arith.constant 0 : i32
    %17 = arith.cmpi eq, %arg1, %c0_i32_14 : i32
    %18 = arith.extui %17 : i1 to i32
    %c0_i32_15 = arith.constant 0 : i32
    %19 = arith.cmpi ne, %18, %c0_i32_15 : i32
    scf.if %19 {
      %c0_16 = arith.constant 0 : index
      %c0_17 = arith.constant 0 : index
      %20 = vector.load %arg10[%c0_16, %c0_17] : memref<16x32xf32, #tpu.memory_space<vmem>>, vector<16x32xf32>
      %c0_18 = arith.constant 0 : index
      %c0_19 = arith.constant 0 : index
      %21 = vector.load %arg6[%c0_18, %c0_19] : memref<1x32xf32, #tpu.memory_space<vmem>>, vector<1x32xf32>
      %22 = vector.broadcast %21 : vector<1x32xf32> to vector<16x32xf32>
      %23 = arith.addf %20, %22 : vector<16x32xf32>
      %c0_20 = arith.constant 0 : index
      %c0_21 = arith.constant 0 : index
      %24 = vector.load %arg2[%c0_20, %c0_21] : memref<16x32xbf16, #tpu.memory_space<vmem>>, vector<16x32xbf16>
      %25 = arith.extf %24 : vector<16x32xbf16> to vector<16x32xf32>
      %26 = arith.addf %23, %25 : vector<16x32xf32>
      %cst_22 = arith.constant dense<0.000000e+00> : vector<16xf32>
      %27 = vector.multi_reduction <add>, %26, %cst_22 [1] : vector<16x32xf32> to vector<16xf32>
      %28 = vector.shape_cast %27 : vector<16xf32> to vector<16x1xf32>
      %cst_23 = arith.constant 3.200000e+01 : f32
      %29 = vector.broadcast %cst_23 : f32 to vector<16x1xf32>
      %30 = arith.divf %28, %29 : vector<16x1xf32>
      %31 = arith.mulf %26, %26 : vector<16x32xf32>
      %cst_24 = arith.constant dense<0.000000e+00> : vector<16xf32>
      %32 = vector.multi_reduction <add>, %31, %cst_24 [1] : vector<16x32xf32> to vector<16xf32>
      %33 = vector.shape_cast %32 : vector<16xf32> to vector<16x1xf32>
      %cst_25 = arith.constant 3.200000e+01 : f32
      %34 = vector.broadcast %cst_25 : f32 to vector<16x1xf32>
      %35 = arith.divf %33, %34 : vector<16x1xf32>
      %36 = arith.mulf %30, %30 : vector<16x1xf32>
      %37 = arith.subf %35, %36 : vector<16x1xf32>
      %38 = vector.broadcast %30 : vector<16x1xf32> to vector<16x32xf32>
      %39 = arith.subf %26, %38 : vector<16x32xf32>
      %cst_26 = arith.constant 9.99999974E-6 : f32
      %40 = vector.broadcast %cst_26 : f32 to vector<16x1xf32>
      %41 = arith.addf %37, %40 : vector<16x1xf32>
      %42 = math.rsqrt %41 : vector<16x1xf32>
      %43 = vector.broadcast %42 : vector<16x1xf32> to vector<16x32xf32>
      %44 = arith.mulf %39, %43 : vector<16x32xf32>
      %c0_27 = arith.constant 0 : index
      %c0_28 = arith.constant 0 : index
      %45 = vector.load %arg7[%c0_27, %c0_28] : memref<1x32xf32, #tpu.memory_space<vmem>>, vector<1x32xf32>
      %46 = vector.broadcast %45 : vector<1x32xf32> to vector<16x32xf32>
      %47 = arith.mulf %44, %46 : vector<16x32xf32>
      %c0_29 = arith.constant 0 : index
      %c0_30 = arith.constant 0 : index
      %48 = vector.load %arg8[%c0_29, %c0_30] : memref<1x32xf32, #tpu.memory_space<vmem>>, vector<1x32xf32>
      %49 = vector.broadcast %48 : vector<1x32xf32> to vector<16x32xf32>
      %50 = arith.addf %47, %49 : vector<16x32xf32>
      %51 = arith.truncf %50 : vector<16x32xf32> to vector<16x32xbf16>
      %c0_31 = arith.constant 0 : index
      %c0_32 = arith.constant 0 : index
      %52 = vector.load %arg9[%c0_31, %c0_32] : memref<16x32xbf16, #tpu.memory_space<vmem>>, vector<16x32xbf16>
      tpu.vector_store %arg9[%c0_31, %c0_32], %51 {strides = array<i32>} : memref<16x32xbf16, #tpu.memory_space<vmem>>, vector<16x32xbf16>,
    } else {
    }
    return
  }
  func.func @transform_0(%arg0: i32, %arg1: i32) -> (i32, i32) {
    %c0_i32 = arith.constant 0 : i32
    %c0_i32_0 = arith.constant 0 : i32
    return %arg0, %c0_i32 : i32, i32
  }
  func.func @transform_1(%arg0: i32, %arg1: i32) -> (i32, i32) {
    %c0_i32 = arith.constant 0 : i32
    %c0_i32_0 = arith.constant 0 : i32
    return %c0_i32, %arg1 : i32, i32
  }
  func.func @transform_2(%arg0: i32, %arg1: i32) -> (i32, i32) {
    %c0_i32 = arith.constant 0 : i32
    %c0_i32_0 = arith.constant 0 : i32
    return %c0_i32, %arg1 : i32, i32
  }
  func.func @transform_3(%arg0: i32, %arg1: i32) -> (i32, i32) {
    %c0_i32 = arith.constant 0 : i32
    %c0_i32_0 = arith.constant 0 : i32
    return %arg1, %c0_i32 : i32, i32
  }
  func.func @transform_4(%arg0: i32, %arg1: i32) -> (i32, i32) {
    %c0_i32 = arith.constant 0 : i32
    %c0_i32_0 = arith.constant 0 : i32
    %c0_i32_1 = arith.constant 0 : i32
    return %c0_i32, %c0_i32_0 : i32, i32
  }
  func.func @transform_5(%arg0: i32, %arg1: i32) -> (i32, i32) {
    %c0_i32 = arith.constant 0 : i32
    %c0_i32_0 = arith.constant 0 : i32
    %c0_i32_1 = arith.constant 0 : i32
    return %c0_i32, %c0_i32_0 : i32, i32
  }
  func.func @transform_6(%arg0: i32, %arg1: i32) -> (i32, i32) {
    %c0_i32 = arith.constant 0 : i32
    %c0_i32_0 = arith.constant 0 : i32
    %c0_i32_1 = arith.constant 0 : i32
    return %c0_i32, %c0_i32_0 : i32, i32
  }
  func.func @transform_7(%arg0: i32, %arg1: i32) -> (i32, i32) {
    %c0_i32 = arith.constant 0 : i32
    %c0_i32_0 = arith.constant 0 : i32
    return %arg0, %c0_i32 : i32, i32
  }
}

</mosaic_0001>

<bundles_post_ra>
// kernel: transformer_model.9
= control target key start
LH: loop header
LB: loop body
LE: loop exit
PB: predicated region body
PF: predicated region fallthrough
CT: control target
= control target key end

     0   :  { %s775_s12 = smov 0   ;;  %s777_s13 = smov 0   ;;  %s849_s0 = inlined_call_operand.vmem [shape: bf16[2,4,8,8], index: 0, kind: input, shape index: {}]   ;;  %s850_s1 = inlined_call_operand.vmem [shape: bf16[2,4,8,8], index: 1, kind: input, shape index: {}]   ;;  %s851_s2 = inlined_call_operand.vmem [shape: bf16[2,4,8,8], index: 2, kind: input, shape index: {}]   ;;  %s852_s3 = inlined_call_operand.vmem [shape: bf16[2,4,8,8], index: 3, kind: output, shape index: {}]  }
   0x1   :  { %s779_s14 = smov 0   ;;  %s781_s15 = smov 0  }
   0x2   :  { %s783_s16 = smov 0  }
   0x3 LB: > { %s35_s17 = sadd.s32 1, %s741_s14  ;;  %s39_s18 = sadd.s32 1, %s745_s15  ;;  %s749_s16 = sphi %s783_s16, %s13_s16   ;;  %s745_s15 = sphi %s781_s15, %s856_s15   ;;  %s741_s14 = sphi %s779_s14, %s855_s14   ;;  %s737_s13 = sphi %s777_s13, %s854_s13   ;;  %s733_s12 = sphi %s775_s12, %s853_s12  }
   0x4   : > { %p37_p0 = scmp.ge.s32.totalorder %s35_s17, 4  ;;  %p630_p1 = scmp.ge.s32.totalorder %s749_s16, 1 }
   0x5   : > { %p217_p2 = scmp.lt.s32.totalorder %s749_s16, 9 }
   0x6   : > { %s858_s17 = smov (%p37_p0, %s35_s17), 0  ;;  %s860_s18 = smov (!%p37_p0, %s39_s18), %s745_s15 }
   0x7   : > { %p218_p3 = pnand %p630_p1, %p217_p2  ;;  %p41_p4 = scmp.ge.s32.totalorder %s860_s18, 2 }
   0x8   : > { %p275_p5 = scmp.lt.s32.totalorder (!%p218_p3), %s737_s13, 1  ;;  %p277_p6 = scmp.lt.s32.totalorder (!%p218_p3), %s733_s12, 3  ;;  %vm327_vm0 = vcmask (!%p218_p3), 64512   ;;  %v751_v0 = vmov (!%p218_p3), 0.0   ;;  %vm752_vm1 = vmmov (!%p218_p3), 0   ;;  %vm324_vm2 = vcmask (!%p218_p3), 7168  }
   0x9   : > { %s862_s18 = smov (%p41_p4, %s860_s18), 0  ;;  %221 = sbr.rel (%p218_p3) target bundleno = 827 (0x33b), region = 32 }
   0xa   : > { %647 = vmatprep.subr.bf16.mxu0 (!%p218_p3), %v751_v0  ;;  %328 = vst.msk [vmem:[#allocation4] sm:$0xff] (!%p218_p3), %vm327_vm0, %v751_v0  ;;  %649 = vmatprep.mubr.msk.bf16.mxu0 (!%p218_p3), %vm752_vm1, %v751_v0  ;;  %v753_v7 = vmov (!%p218_p3), -inf   ;;  %v754_v13 = vmov (!%p218_p3), 0   ;;  %vm417_vm3 = vcmask (!%p218_p3), 1043456   ;;  %vm477_vm4 = vcmask (!%p218_p3), 60416  }
   0xb   : > { %653 = vmatprep.subr.bf16.mxu1 (!%p218_p3), %v751_v0  ;;  %655 = vmatprep.mubr.msk.bf16.mxu1 (!%p218_p3), %vm752_vm1, %v751_v0  ;;  %325 = vst.msk [vmem:[#allocation2] sm:$0xff] (!%p218_p3), %vm324_vm2, %v753_v7  ;;  %326 = vst.msk [vmem:[#allocation3] sm:$0xff] (!%p218_p3), %vm324_vm2, %v751_v0 }
   0xc   : > { %703 = vset.pattern.permute.xlu0 (!%p218_p3), %v754_v13  ;;  %704 = vset.pattern.permute.xlu1 (!%p218_p3), %v754_v13 }
  0x10   : > { %s864_s13 = smov (!%p275_p5, %s737_s13), 1  ;;  %s866_s12 = smov (!%p277_p6, %s733_s12), 3 }
  0x11   : > { %s631_s19 = sshll.u32 %s864_s13, 2  ;;  %v405_v34 = vld [vmem:[#allocation4] sm:$0xff] }
  0x12   : > { %s283_s20 = sadd.s32 %s631_s19, %s866_s12  ;;  %v381_v14 = vld [vmem:[#allocation2] sm:$0xff]  ;;  %v397_v28 = vld [vmem:[#allocation3] sm:$0xff] }
  0x13   : > { %s806_s21 = sshll.u32 %s283_s20, 2 }
  0x14   : > { %s296_s24 = scalar_lea.vmem %s850_s1, %s806_s21  ;;  %s285_s27 = scalar_lea.vmem %s849_s0, %s806_s21 }
  0x15   : > { %v333_v1 = vld [vmem:[%s296_s24] sm:$0xf]  ;;  %s307_s30 = scalar_lea.vmem %s851_s2, %s806_s21  ;;  %s318_s6 = scalar_lea.vmem %s852_s3, %s806_s21 }
  0x16   : > { %v329_v2 = vld [vmem:[%s285_s27] sm:$0xf]  ;;  %v339_v3 = vsel %vm327_vm0, %v333_v1, 0 }
  0x17   : > { %v330_v4 = vunpack.c.l.bf16 %v329_v2  ;;  %648 = vmatpush3.bf16.xpose.msra.mxu0 %v339_v3  ;;  %v413_v18 = vld [vmem:[%s307_s30] sm:$0xf] }
  0x18   : > { %v419_v19 = vsel %vm417_vm3, %v413_v18, 0 }
  0x19   : > { %v331_v5 = vmul.f32 0.35355338, %v330_v4  ;;  %654 = vmatpush3.bf16.msra.mxu1 %v419_v19 }
  0x1b   : > { %v332_v6 = vpack.c.bf16 %v331_v5, %v331_v5 }
  0x1e   : > { %650 = vmatmul.mubr.msk.bf16.vlgmr.msra.gmra.mrb[0].mxu0 %vm327_vm0, %v332_v6 }
  0xf1   : > { %v375_v8 = vpop.f32.mrb[0].mxu0 }
  0xf2   : > { %v651_v9 = vpop.f32.mrb[1].mxu0  ;;  %v382_v10 = vsel %vm327_vm0, %v375_v8, -inf }
  0xf3   : > { %383 = vmax.xlane.f32.xlu0 %v382_v10  ;;  %v378_v11 = vpop.f32.mrb[2].mxu0 }
  0xf4   : > { %v652_v12 = vpop.f32.mrb[3].mxu0 }
 0x180   : > { %v384_v15 = vpop.xlane.xlu0 %383 }
 0x181   : > { %v385_v16 = vmax.f32 %v381_v14, %v384_v15 }
 0x183   : > { %v386_v17 = vsub.f32 %v381_v14, %v385_v16  ;;  %463 = vst.msk [vmem:[#allocation2] sm:$0xff] %vm324_vm2, %v385_v16  ;;  %391 = vperm.xlu0 %703, %v385_v16  }
 0x185   : > { %v387_v26 = vmul.f32 1.442695, %v386_v17 }
 0x202   : > { %v392_v20 = vpop.permute.xlu0 %391 }
 0x203   : > { %v394_v21 = vsub.f32 %v375_v8, %v392_v20 }
 0x205   : > { %v395_v22 = vmul.f32 1.442695, %v394_v21 }
 0x207   : > { %705 = vpow2.f32 %v395_v22 }
 0x208   : > { %707 = vpow2.f32 %v387_v26 }
 0x211   : > { %v706_v23 = vpop.eup %705 }
 0x212   : > { %v399_v24 = vsel %vm327_vm0, %v706_v23, 0.0  ;;  %v412_v25 = vpack.c.bf16 %v706_v23, %v706_v23  ;;  %v708_v27 = vpop.eup %707 }
 0x213   : > { %400 = vadd.xlane.f32.xlu1 %v399_v24  ;;  %v398_v29 = vmul.f32 %v708_v27, %v397_v28 }
 0x214   : > { %656 = vmatmul.mubr.msk.bf16.vlgmr.msra.gmra.mrb[0].mxu1 %vm327_vm0, %v412_v25 }
 0x224   : > { %408 = vperm.xlu1 %704, %v708_v27  }
 0x2a0   : > { %v401_v30 = vpop.xlane.xlu1 %400 }
 0x2a1   : > { %v402_v31 = vadd.f32 %v401_v30, %v398_v29 }
 0x2a3   : > { %404 = vst.msk [vmem:[#allocation3] sm:$0xff] %vm324_vm2, %v402_v31 }
 0x2a4   : > { %v409_v35 = vpop.permute.xlu1 %408 }
 0x2a5   : > { %v411_v36 = vmul.f32 %v409_v35, %v405_v34 }
 0x2aa   : > { %v468_v32 = vld [vmem:[#allocation3] sm:$0xff] }
 0x2ab   : > { %709 = vrcp.f32 %v468_v32 }
 0x2b5   : > { %v710_v33 = vpop.eup %709 }
 0x2b6   : > { %472 = vperm.xlu1 %704, %v710_v33  }
 0x2e7   : > { %v455_v37 = vpop.f32.mrb[0].mxu1 }
 0x2e8   : > { %v461_v38 = vadd.f32 %v455_v37, %v411_v36  ;;  %v657_v39 = vpop.f32.mrb[1].mxu1 }
 0x2e9   : > { %v458_v40 = vpop.f32.mrb[2].mxu1 }
 0x2ea   : > { %462 = vst.msk [vmem:[#allocation4] sm:$0xff] %vm327_vm0, %v461_v38  ;;  %v658_v41 = vpop.f32.mrb[3].mxu1 }
 0x2f1   : > { %v467_v42 = vld [vmem:[#allocation4] sm:$0xff] }
 0x335   : > { %v473_v43 = vpop.permute.xlu1 %472 }
 0x336   : > { %v475_v44 = vmul.f32 %v473_v43, %v467_v42 }
 0x338   : > { %v476_v45 = vpack.c.bf16 %v475_v44, %v475_v44 }
 0x33a   : > { %478 = vst.msk [vmem:[%s318_s6] sm:$0xf] %vm477_vm4, %v476_v45 }
 0x33b PF: > { %s13_s16 = sadd.s32 1, %s749_s16   ;;  %s853_s12 = smov %s741_s14 }
 0x33c   : > { %p10_p7 = scmp.ge.s32.totalorder %s13_s16, 10   ;;  %s854_s13 = smov %s745_s15 }
 0x33d   : > { %s855_s14 = smov %s858_s17  ;;  %s856_s15 = smov %s862_s18 }
 0x33e   :  { %12 = sbr.rel (!%p10_p7) target bundleno = 3 (0x3), region = 76 }

// kernel: transformer_model.8
= control target key start
LH: loop header
LB: loop body
LE: loop exit
PB: predicated region body
PF: predicated region fallthrough
CT: control target
= control target key end

     0   :  { %vm19_vm0 = vcmask 785408   ;;  %v151_v0 = vmov 0.0   ;;  %vm152_vm1 = vmmov 0   ;;  %vm47_vm2 = vcmask 261120   ;;  %s195_s1 = inlined_call_operand.vmem [shape: bf16[32,96], index: 1, kind: input, shape index: {}]   ;;  %s196_s0 = inlined_call_operand.vmem [shape: bf16[16,32], index: 0, kind: input, shape index: {}]   ;;  %s197_s2 = inlined_call_operand.vmem [shape: f32[1,96], index: 2, kind: input, shape index: {}]   ;;  %s198_s3 = inlined_call_operand.vmem [shape: bf16[16,96], index: 3, kind: output, shape index: {}]  }
   0x1   :  { %138 = vmatprep.subr.bf16.mxu0 %v151_v0  ;;  %v148_v1 = vld [vmem:[%s195_s1] sm:$0xff]   ;;  %142 = vmatprep.mubr.msk.bf16.mxu0 %vm152_vm1, %v151_v0  ;;  %20 = vst.msk [vmem:[#allocation2] sm:$0xff] %vm19_vm0, %v151_v0  ;;  %21 = vst.msk [vmem:[#allocation2 + $0x8] sm:$0xff] %vm19_vm0, %v151_v0  ;;  %v149_v2 = vld [vmem:[%s195_s1 + $0x8] sm:$0xff]   ;;  %vm119_vm3 = vcmask 781312  }
   0x2   :  { %139 = vmatpush3.bf16.msra.mxu0 %v148_v1  ;;  %v150_v3 = vld [vmem:[%s196_s0] sm:$0xff]  }
   0x3   :  { %140 = vmatprep.subr.bf16.mxu0 %v151_v0  ;;  %v130_v12 = vld [vmem:[%s197_s2] ss:$0 sm:$0xff] }
   0x6   :  { %141 = vmatpush3.bf16.msra.mxu0 %v149_v2 }
   0x8   :  { %v22_v4 = vld [vmem:[#allocation2] sm:$0xff]  ;;  %v23_v6 = vld [vmem:[#allocation2 + $0x8] sm:$0xff] }
   0x9   :  { %143 = vmatmul.mubr.msk.bf16.vlgmr.msra.gmra.mrb[0].mxu0 %vm47_vm2, %v150_v3 }
  0xdc   :  { %v85_v5 = vpop.f32.mrb[0].mxu0 }
  0xdd   :  { %v92_v7 = vadd.f32 %v85_v5, %v22_v4  ;;  %v144_v8 = vpop.f32.mrb[1].mxu0 }
  0xde   :  { %v88_v9 = vpop.f32.mrb[2].mxu0 }
  0xdf   :  { %95 = vst.msk [vmem:[#allocation2] sm:$0xff] %vm19_vm0, %v92_v7  ;;  %v93_v10 = vadd.f32 %v88_v9, %v23_v6  ;;  %v145_v11 = vpop.f32.mrb[3].mxu0 }
  0xe1   :  { %96 = vst.msk [vmem:[#allocation2 + $0x8] sm:$0xff] %vm19_vm0, %v93_v10 }
  0xe6   :  { %v100_v13 = vld [vmem:[#allocation2] sm:$0xff] }
  0xe7   :  { %v109_v14 = vadd.f32 %v130_v12, %v100_v13 }
  0xe8   :  { %v101_v15 = vld [vmem:[#allocation2 + $0x8] sm:$0xff] }
  0xe9   :  { %v133_v16 = vpack.c.bf16 %v109_v14, %v109_v14  ;;  %v110_v17 = vadd.f32 %v130_v12, %v101_v15 }
  0xeb   :  { %120 = vst.msk [vmem:[%s198_s3] sm:$0xf] %vm119_vm3, %v133_v16  ;;  %v134_v18 = vpack.c.bf16 %v110_v17, %v110_v17 }
  0xed   :  { %121 = vst.msk [vmem:[%s198_s3 + $0x4] sm:$0xf] %vm119_vm3, %v134_v18 }

// kernel: transformer_model.10
= control target key start
LH: loop header
LB: loop body
LE: loop exit
PB: predicated region body
PF: predicated region fallthrough
CT: control target
= control target key end

     0   :  { %vm28_vm0 = vcmask 261120   ;;  %v224_v0 = vmov 0.0   ;;  %vm225_vm1 = vmmov 0   ;;  %vm182_vm2 = vcmask 257024   ;;  %s297_s1 = inlined_call_operand.vmem [shape: bf16[32,32], index: 1, kind: input, shape index: {}]   ;;  %s298_s0 = inlined_call_operand.vmem [shape: bf16[16,32], index: 0, kind: input, shape index: {}]   ;;  %s299_s3 = inlined_call_operand.vmem [shape: bf16[16,32], index: 3, kind: input, shape index: {}]   ;;  %s300_s2 = inlined_call_operand.vmem [shape: f32[1,32], index: 2, kind: input, shape index: {}]   ;;  %s301_s4 = inlined_call_operand.vmem [shape: f32[1,32], index: 4, kind: input, shape index: {}]   ;;  %s302_s5 = inlined_call_operand.vmem [shape: f32[1,32], index: 5, kind: input, shape index: {}]   ;;  %s303_s6 = inlined_call_operand.vmem [shape: bf16[16,32], index: 6, kind: output, shape index: {}]  }
   0x1   :  { %207 = vmatprep.subr.bf16.mxu0 %v224_v0  ;;  %v217_v1 = vld [vmem:[%s297_s1] sm:$0xff]   ;;  %211 = vmatprep.mubr.msk.bf16.mxu0 %vm225_vm1, %v224_v0  ;;  %29 = vst.msk [vmem:[#allocation2] sm:$0xff] %vm28_vm0, %v224_v0  ;;  %30 = vst.msk [vmem:[#allocation2 + $0x8] sm:$0xff] %vm28_vm0, %v224_v0  ;;  %v218_v2 = vld [vmem:[%s297_s1 + $0x8] sm:$0xff]  }
   0x2   :  { %208 = vmatpush3.bf16.msra.mxu0 %v217_v1  ;;  %v219_v3 = vld [vmem:[%s298_s0] sm:$0xff]  }
   0x3   :  { %209 = vmatprep.subr.bf16.mxu0 %v224_v0  ;;  %v201_v12 = vld [vmem:[%s299_s3] sm:$0xff]  }
   0x4   :  { %v193_v13 = vld [vmem:[%s300_s2] ss:$0 sm:$0xff]  ;;  %v202_v14 = vunpack.c.l.bf16 %v201_v12  ;;  %v203_v17 = vunpack.c.h.bf16 %v201_v12 }
   0x5   :  { %v194_v44 = vld [vmem:[%s301_s4] ss:$0 sm:$0xff] }
   0x6   :  { %210 = vmatpush3.bf16.msra.mxu0 %v218_v2  ;;  %v195_v46 = vld [vmem:[%s302_s5] ss:$0 sm:$0xff] }
   0x8   :  { %v31_v4 = vld [vmem:[#allocation2] sm:$0xff]  ;;  %v32_v6 = vld [vmem:[#allocation2 + $0x8] sm:$0xff] }
   0x9   :  { %212 = vmatmul.mubr.msk.bf16.vlgmr.msra.gmra.mrb[0].mxu0 %vm28_vm0, %v219_v3 }
  0xdc   :  { %v94_v5 = vpop.f32.mrb[0].mxu0 }
  0xdd   :  { %v101_v7 = vadd.f32 %v94_v5, %v31_v4  ;;  %v213_v8 = vpop.f32.mrb[1].mxu0 }
  0xde   :  { %v97_v9 = vpop.f32.mrb[2].mxu0 }
  0xdf   :  { %103 = vst.msk [vmem:[#allocation2] sm:$0xff] %vm28_vm0, %v101_v7  ;;  %v102_v10 = vadd.f32 %v97_v9, %v32_v6  ;;  %v214_v11 = vpop.f32.mrb[3].mxu0 }
  0xe1   :  { %104 = vst.msk [vmem:[#allocation2 + $0x8] sm:$0xff] %vm28_vm0, %v102_v10 }
  0xe6   :  { %v108_v15 = vld [vmem:[#allocation2] sm:$0xff] }
  0xe7   :  { %v117_v16 = vadd.f32 %v193_v13, %v108_v15 }
  0xe8   :  { %v109_v18 = vld [vmem:[#allocation2 + $0x8] sm:$0xff] }
  0xe9   :  { %v123_v19 = vadd.f32 %v202_v14, %v117_v16  ;;  %v118_v20 = vadd.f32 %v193_v13, %v109_v18 }
  0xeb   :  { %v125_v21 = vsel %vm28_vm0, %v123_v19, 0.0  ;;  %v134_v22 = vmul.f32 %v123_v19, %v123_v19  ;;  %v124_v23 = vadd.f32 %v203_v17, %v118_v20 }
  0xec   :  { %126 = vadd.xlane.f32.xlu0 %v125_v21 }
  0xed   :  { %v136_v24 = vsel %vm28_vm0, %v134_v22, 0.0  ;;  %v135_v25 = vmul.f32 %v124_v23, %v124_v23  ;;  %v128_v26 = vsel %vm28_vm0, %v124_v23, 0.0 }
  0xee   :  { %137 = vadd.xlane.f32.xlu1 %v136_v24 }
  0xef   :  { %v139_v27 = vsel %vm28_vm0, %v135_v25, 0.0 }
  0xf0   :  { %129 = vadd.xlane.f32.xlu0 %v128_v26 }
  0xf2   :  { %140 = vadd.xlane.f32.xlu1 %v139_v27 }
 0x179   :  { %v127_v28 = vpop.xlane.xlu0 %126 }
 0x17a   :  { %v132_v29 = vmul.f32 0.03125, %v127_v28 }
 0x17b   :  { %v138_v30 = vpop.xlane.xlu1 %137 }
 0x17c   :  { %v144_v31 = vmul.f32 %v132_v29, %v132_v29  ;;  %v142_v32 = vmul.f32 0.03125, %v138_v30  ;;  %v148_v42 = vsub.f32 %v123_v19, %v132_v29 }
 0x17d   :  { %v130_v33 = vpop.xlane.xlu0 %129 }
 0x17e   :  { %v146_v34 = vsub.f32 %v142_v32, %v144_v31  ;;  %v133_v35 = vmul.f32 0.03125, %v130_v33 }
 0x17f   :  { %v141_v36 = vpop.xlane.xlu1 %140 }
 0x180   :  { %v150_v37 = vadd.f32 1e-05, %v146_v34  ;;  %v145_v38 = vmul.f32 %v133_v35, %v133_v35  ;;  %v143_v39 = vmul.f32 0.03125, %v141_v36  ;;  %v149_v48 = vsub.f32 %v124_v23, %v133_v35 }
 0x182   :  { %220 = vrsqrt.f32 %v150_v37  ;;  %v147_v40 = vsub.f32 %v143_v39, %v145_v38 }
 0x184   :  { %v151_v41 = vadd.f32 1e-05, %v147_v40 }
 0x186   :  { %222 = vrsqrt.f32 %v151_v41 }
 0x18c   :  { %v221_v43 = vpop.eup %220 }
 0x18d   :  { %v154_v45 = vmul.f32 %v221_v43, %v148_v42 }
 0x18f   :  { %v163_v47 = vmul.f32 %v194_v44, %v154_v45 }
 0x190   :  { %v223_v49 = vpop.eup %222 }
 0x191   :  { %v172_v50 = vadd.f32 %v195_v46, %v163_v47  ;;  %v155_v51 = vmul.f32 %v223_v49, %v149_v48 }
 0x193   :  { %v198_v52 = vpack.c.bf16 %v172_v50, %v172_v50  ;;  %v164_v53 = vmul.f32 %v194_v44, %v155_v51 }
 0x195   :  { %183 = vst.msk [vmem:[%s303_s6] sm:$0xf] %vm182_vm2, %v198_v52  ;;  %v173_v54 = vadd.f32 %v195_v46, %v164_v53 }
 0x197   :  { %v199_v55 = vpack.c.bf16 %v173_v54, %v173_v54 }
 0x199   :  { %184 = vst.msk [vmem:[%s303_s6 + $0x4] sm:$0xf] %vm182_vm2, %v199_v55 }

// kernel: transformer_model.11
= control target key start
LH: loop header
LB: loop body
LE: loop exit
PB: predicated region body
PF: predicated region fallthrough
CT: control target
= control target key end

     0   :  { %vm31_vm0 = vcmask 261120   ;;  %v341_v0 = vmov 0.0   ;;  %vm342_vm1 = vmmov 0   ;;  %vm146_vm2 = vcmask 523264   ;;  %s434_s1 = inlined_call_operand.vmem [shape: bf16[32,64], index: 1, kind: input, shape index: {}]   ;;  %s435_s3 = inlined_call_operand.vmem [shape: bf16[64,32], index: 3, kind: input, shape index: {}]   ;;  %s436_s0 = inlined_call_operand.vmem [shape: bf16[16,32], index: 0, kind: input, shape index: {}]   ;;  %s437_s2 = inlined_call_operand.vmem [shape: f32[1,64], index: 2, kind: input, shape index: {}]   ;;  %s438_s4 = inlined_call_operand.vmem [shape: f32[1,32], index: 4, kind: input, shape index: {}]   ;;  %s439_s5 = inlined_call_operand.vmem [shape: f32[1,32], index: 5, kind: input, shape index: {}]   ;;  %s440_s6 = inlined_call_operand.vmem [shape: f32[1,32], index: 6, kind: input, shape index: {}]   ;;  %s441_s7 = inlined_call_operand.vmem [shape: bf16[16,32], index: 7, kind: output, shape index: {}]  }
   0x1   :  { %308 = vmatprep.subr.bf16.mxu0 %v341_v0  ;;  %v330_v1 = vld [vmem:[%s434_s1] sm:$0xff]   ;;  %312 = vmatprep.mubr.msk.bf16.mxu0 %vm342_vm1, %v341_v0  ;;  %32 = vst.msk [vmem:[#allocation2] sm:$0xff] %vm31_vm0, %v341_v0  ;;  %33 = vst.msk [vmem:[#allocation2 + $0x8] sm:$0xff] %vm31_vm0, %v341_v0  ;;  %v331_v2 = vld [vmem:[%s434_s1 + $0x8] sm:$0xff]   ;;  %vm272_vm3 = vcmask 257024  }
   0x2   :  { %316 = vmatprep.subr.bf16.mxu1 %v341_v0  ;;  %324 = vmatprep.mubr.msk.bf16.mxu1 %vm342_vm1, %v341_v0  ;;  %v333_v3 = vld [vmem:[%s435_s3] sm:$0xff]   ;;  %v334_v5 = vld [vmem:[%s435_s3 + $0x8] sm:$0xff]   ;;  %v335_v6 = vld [vmem:[%s435_s3 + $0x10] sm:$0xff]  }
   0x3   :  { %309 = vmatpush3.bf16.msra.mxu0 %v330_v1  ;;  %v332_v4 = vld [vmem:[%s436_s0] sm:$0xff]   ;;  %317 = vmatpush3.bf16.msra.mxu1 %v333_v3  ;;  %v336_v7 = vld [vmem:[%s435_s3 + $0x18] sm:$0xff]  }
   0x4   :  { %310 = vmatprep.subr.bf16.mxu0 %v341_v0  ;;  %318 = vmatprep.subr.bf16.mxu1 %v341_v0  ;;  %v279_v8 = vld [vmem:[%s437_s2] ss:$0 sm:$0xff] }
   0x5   :  { %v297_v26 = vld [vmem:[%s436_s0] sm:$0xff]  }
   0x6   :  { %v289_v27 = vld [vmem:[%s438_s4] ss:$0 sm:$0xff]  ;;  %v298_v28 = vunpack.c.l.bf16 %v297_v26  ;;  %v299_v31 = vunpack.c.h.bf16 %v297_v26 }
   0x7   :  { %311 = vmatpush3.bf16.msra.mxu0 %v331_v2  ;;  %319 = vmatpush3.bf16.msra.mxu1 %v334_v5  ;;  %v290_v58 = vld [vmem:[%s439_s5] ss:$0 sm:$0xff] }
   0x8   :  { %320 = vmatprep.subr.bf16.mxu1 %v341_v0  ;;  %v111_v18 = vld [vmem:[#allocation2] sm:$0xff]  ;;  %v112_v20 = vld [vmem:[#allocation2 + $0x8] sm:$0xff] }
   0x9   :  { %v291_v60 = vld [vmem:[%s440_s6] ss:$0 sm:$0xff] }
   0xa   :  { %313 = vmatmul.mubr.msk.bf16.vlgmr.msra.gmra.mrb[0].mxu0 %vm31_vm0, %v332_v4 }
   0xb   :  { %321 = vmatpush3.bf16.msra.mxu1 %v335_v6 }
   0xc   :  { %322 = vmatprep.subr.bf16.mxu1 %v341_v0 }
   0xf   :  { %323 = vmatpush3.bf16.msra.mxu1 %v336_v7 }
  0xdd   :  { %v102_v9 = vpop.f32.mrb[0].mxu0 }
  0xde   :  { %v103_v10 = vadd.f32 %v279_v8, %v102_v9  ;;  %v314_v11 = vpop.f32.mrb[1].mxu0 }
  0xdf   :  { %v105_v12 = vpop.f32.mrb[2].mxu0 }
  0xe0   :  { %v106_v13 = vadd.f32 %v279_v8, %v105_v12  ;;  %v315_v14 = vpop.f32.mrb[3].mxu0  ;;  %v109_v15 = vmax.f32 %v103_v10, 0.0 }
  0xe2   :  { %v110_v16 = vmax.f32 %v106_v13, 0.0 }
  0xe4   :  { %v113_v17 = vpack.c.bf16 %v110_v16, %v109_v15 }
  0xe6   :  { %325 = vmatmul.mubr.msk.bf16.vlgmr.msra.gmra.mrb[0].mxu1 %vm146_vm2, %v113_v17 }
 0x1b9   :  { %v184_v19 = vpop.f32.mrb[0].mxu1 }
 0x1ba   :  { %v191_v21 = vadd.f32 %v184_v19, %v111_v18  ;;  %v326_v22 = vpop.f32.mrb[1].mxu1 }
 0x1bb   :  { %v187_v23 = vpop.f32.mrb[2].mxu1 }
 0x1bc   :  { %193 = vst.msk [vmem:[#allocation2] sm:$0xff] %vm31_vm0, %v191_v21  ;;  %v192_v24 = vadd.f32 %v187_v23, %v112_v20  ;;  %v327_v25 = vpop.f32.mrb[3].mxu1 }
 0x1be   :  { %194 = vst.msk [vmem:[#allocation2 + $0x8] sm:$0xff] %vm31_vm0, %v192_v24 }
 0x1c3   :  { %v198_v29 = vld [vmem:[#allocation2] sm:$0xff] }
 0x1c4   :  { %v207_v30 = vadd.f32 %v289_v27, %v198_v29 }
 0x1c5   :  { %v199_v32 = vld [vmem:[#allocation2 + $0x8] sm:$0xff] }
 0x1c6   :  { %v213_v33 = vadd.f32 %v298_v28, %v207_v30  ;;  %v208_v34 = vadd.f32 %v289_v27, %v199_v32 }
 0x1c8   :  { %v215_v35 = vsel %vm31_vm0, %v213_v33, 0.0  ;;  %v224_v36 = vmul.f32 %v213_v33, %v213_v33  ;;  %v214_v37 = vadd.f32 %v299_v31, %v208_v34 }
 0x1c9   :  { %216 = vadd.xlane.f32.xlu0 %v215_v35 }
 0x1ca   :  { %v226_v38 = vsel %vm31_vm0, %v224_v36, 0.0  ;;  %v225_v39 = vmul.f32 %v214_v37, %v214_v37  ;;  %v218_v40 = vsel %vm31_vm0, %v214_v37, 0.0 }
 0x1cb   :  { %227 = vadd.xlane.f32.xlu1 %v226_v38 }
 0x1cc   :  { %v229_v41 = vsel %vm31_vm0, %v225_v39, 0.0 }
 0x1cd   :  { %219 = vadd.xlane.f32.xlu0 %v218_v40 }
 0x1cf   :  { %230 = vadd.xlane.f32.xlu1 %v229_v41 }
 0x256   :  { %v217_v42 = vpop.xlane.xlu0 %216 }
 0x257   :  { %v222_v43 = vmul.f32 0.03125, %v217_v42 }
 0x258   :  { %v228_v44 = vpop.xlane.xlu1 %227 }
 0x259   :  { %v234_v45 = vmul.f32 %v222_v43, %v222_v43  ;;  %v232_v46 = vmul.f32 0.03125, %v228_v44  ;;  %v238_v56 = vsub.f32 %v213_v33, %v222_v43 }
 0x25a   :  { %v220_v47 = vpop.xlane.xlu0 %219 }
 0x25b   :  { %v236_v48 = vsub.f32 %v232_v46, %v234_v45  ;;  %v223_v49 = vmul.f32 0.03125, %v220_v47 }
 0x25c   :  { %v231_v50 = vpop.xlane.xlu1 %230 }
 0x25d   :  { %v240_v51 = vadd.f32 1e-05, %v236_v48  ;;  %v235_v52 = vmul.f32 %v223_v49, %v223_v49  ;;  %v233_v53 = vmul.f32 0.03125, %v231_v50  ;;  %v239_v62 = vsub.f32 %v214_v37, %v223_v49 }
 0x25f   :  { %337 = vrsqrt.f32 %v240_v51  ;;  %v237_v54 = vsub.f32 %v233_v53, %v235_v52 }
 0x261   :  { %v241_v55 = vadd.f32 1e-05, %v237_v54 }
 0x263   :  { %339 = vrsqrt.f32 %v241_v55 }
 0x269   :  { %v338_v57 = vpop.eup %337 }
 0x26a   :  { %v244_v59 = vmul.f32 %v338_v57, %v238_v56 }
 0x26c   :  { %v253_v61 = vmul.f32 %v290_v58, %v244_v59 }
 0x26d   :  { %v340_v63 = vpop.eup %339 }
 0x26e   :  { %v262_v0 = vadd.f32 %v291_v60, %v253_v61  ;;  %v245_v1 = vmul.f32 %v340_v63, %v239_v62 }
 0x270   :  { %v294_v2 = vpack.c.bf16 %v262_v0, %v262_v0  ;;  %v254_v3 = vmul.f32 %v290_v58, %v245_v1 }
 0x272   :  { %273 = vst.msk [vmem:[%s441_s7] sm:$0xf] %vm272_vm3, %v294_v2  ;;  %v263_v4 = vadd.f32 %v291_v60, %v254_v3 }
 0x274   :  { %v295_v5 = vpack.c.bf16 %v263_v4, %v263_v4 }
 0x276   :  { %274 = vst.msk [vmem:[%s441_s7 + $0x4] sm:$0xf] %vm272_vm3, %v295_v5 }

</bundles_post_ra>
